<compile_context>
chip_gen: v7x
topology: tpu7x:2x2x1
jax: 0.10.0
libtpu: 0.0.40
codegen_flags: <defaults>
</compile_context>

<pallas_src>
import jax
import jax.numpy as jnp
from jax.experimental import pallas as pl
from jax.experimental.pallas import tpu as pltpu

LN_EPS = 1e-5  # torch.nn.LayerNorm default eps


def _layernorm(h):
    # Normalize over the feature (sublane) axis.  gamma/beta are pre-folded into
    # the following Linear, so only the normalization remains in-kernel.
    # E[h] / E[h^2] are independent reductions; var is clamped >= 0 (benign here:
    # activations are O(1) post-ReLU / post-LN).
    mean = jnp.mean(h, axis=0, keepdims=True)
    mean_sq = jnp.mean(h * h, axis=0, keepdims=True)
    var = jnp.maximum(mean_sq - mean * mean, 0.0)
    return (h - mean) * jax.lax.rsqrt(var + LN_EPS)


def mlp_kernel(x_ref, w1_ref, w2_ref, w3_ref, w4_ref, bp_ref, o_ref):
    # x_ref: [TILE_N, F] f32 block in the input's native [N, F] layout.
    # First layer kept in f32 (raw features may be un-normalized); the transpose
    # to the lane-major activation layout is fused with the MXU feed.
    h = jnp.dot(w1_ref[...], x_ref[...].T,
                preferred_element_type=jnp.float32)              # [32, TILE_N]
    h = jnp.maximum(h + bp_ref[0:32, 0:1], 0.0)
    h = _layernorm(h)
    # TODO(synk): nn.Dropout(0.1) is identity in eval mode; training-mode
    # stochastic masking is intentionally not applied here.

    # Linear(32 -> 16) + ReLU + LayerNorm(16)   (bf16 matmul, f32 accumulate)
    h = jnp.dot(w2_ref[...], h.astype(jnp.bfloat16),
                preferred_element_type=jnp.float32)              # [16, TILE_N]
    h = jnp.maximum(h + bp_ref[0:16, 1:2], 0.0)
    h = _layernorm(h)

    # Linear(16 -> 8) + ReLU + LayerNorm(8)
    h = jnp.dot(w3_ref[...], h.astype(jnp.bfloat16),
                preferred_element_type=jnp.float32)              # [8, TILE_N]
    h = jnp.maximum(h + bp_ref[0:8, 2:3], 0.0)
    h = _layernorm(h)

    # Linear(8 -> 1) + Sigmoid: weighted sublane reduction (VPU + XLU) instead of
    # an MXU matmul; lane-dense [1, TILE_N] store.
    logits = jnp.sum(h * w4_ref[...], axis=0, keepdims=True) + bp_ref[0:1, 3:4]
    o_ref[...] = jax.nn.sigmoid(logits)


def prepare_operands(params):
    """Fold LN gamma/beta into the next Linear and pack/cast parameters once."""
    (w1, b1), (w2, b2), (w3, b3), (w4, b4) = params["linears"]
    (g1, be1), (g2, be2), (g3, be3) = params["lns"]

    # LN(h) = gamma * n(h) + beta feeds straight into the next Linear, so
    #   W @ LN(h) + b == (W * gamma) @ n(h) + (b + W @ beta)   (exact).
    w2f, b2f = w2 * g1[None, :], b2 + w2 @ be1
    w3f, b3f = w3 * g2[None, :], b3 + w3 @ be2
    w4f, b4f = w4 * g3[None, :], b4 + w4 @ be3

    w1 = w1.astype(jnp.float32)                    # [32, 8]   f32 (raw inputs)
    w2f = w2f.astype(jnp.bfloat16)                 # [16, 32]
    w3f = w3f.astype(jnp.bfloat16)                 # [8, 16]
    w4col = w4f.astype(jnp.float32).T              # [8, 1]    VPU/XLU path

    bpack = jnp.zeros((32, 4), jnp.float32)        # one padded (8,128) VMEM tile
    bpack = bpack.at[:32, 0].set(b1)
    bpack = bpack.at[:16, 1].set(b2f)
    bpack = bpack.at[:8, 2].set(b3f)
    bpack = bpack.at[:1, 3].set(b4f)
    return w1, w2f, w3f, w4col, bpack


def fault_prediction_gnn(x, params, *, tile_n=4096):
    """x: [N, feature_dim] float32 (native layout). Returns [N, 1] probabilities."""
    x = jnp.asarray(x, jnp.float32)
    n, f = x.shape
    w1, w2, w3, w4col, bpack = prepare_operands(params)

    # Lane tile: multiple of 128, large enough to amortize ~0.35us/step grid
    # overhead, capped so the grid has >= 2 steps when the batch allows
    # (so "parallel" can shard the lane-tile loop across v7x's 2 TensorCores).
    n_lanes = ((n + 127) // 128) * 128
    tile_n = max(128, (min(tile_n, n_lanes) // 128) * 128)
    if n_lanes >= 256:
        tile_n = min(tile_n, max(128, ((n_lanes // 2) // 128) * 128))
    grid = (pl.cdiv(n, tile_n),)

    def resident(a):
        # Same block every grid step -> stays VMEM-resident (no re-DMA).
        return pl.BlockSpec(a.shape, lambda i: (0, 0))

    out = pl.pallas_call(
        mlp_kernel,
        out_shape=jax.ShapeDtypeStruct((1, n), jnp.float32),
        grid=grid,
        in_specs=[
            pl.BlockSpec((tile_n, f), lambda i: (i, 0)),   # streamed input tiles
            resident(w1), resident(w2), resident(w3),
            resident(w4col), resident(bpack),
        ],
        out_specs=pl.BlockSpec((1, tile_n), lambda i: (0, i)),  # lane-dense store
        compiler_params=pltpu.CompilerParams(
            dimension_semantics=("parallel",),
            vmem_limit_bytes=32 * 1024 * 1024,
        ),
    )(x, w1, w2, w3, w4col, bpack)

    return out.reshape(n, 1)


def _orthogonal(key, out_dim, in_dim):
    """Deterministic orthogonal init (gain=1.0), mirroring nn.init.orthogonal_."""
    m = max(out_dim, in_dim)
    a = jax.random.normal(key, (m, m), dtype=jnp.float32)
    q, r = jnp.linalg.qr(a)
    d = jnp.diagonal(r)
    q = q * jnp.where(d >= 0, 1.0, -1.0)[None, :]
    return q[:out_dim, :in_dim]


def init_params(key, feature_dim=8):
    dims = [(feature_dim, 32), (32, 16), (16, 8), (8, 1)]
    keys = jax.random.split(key, len(dims))
    linears = []
    for k, (fin, fout) in zip(keys, dims):
        w = _orthogonal(k, fout, fin).astype(jnp.float32)   # [out, in] PyTorch layout
        b = jnp.full((fout,), 0.01, dtype=jnp.float32)
        linears.append((w, b))
    lns = [(jnp.ones((feat,), jnp.float32), jnp.zeros((feat,), jnp.float32))
           for feat in (32, 16, 8)]
    return {"linears": linears, "lns": lns}


def reference_forward(x, params):
    """Pure-JAX f32 reference (mirrors the PyTorch nn.Sequential in eval mode)."""
    h = x
    linears, lns = params["linears"], params["lns"]
    for li, (w, b) in enumerate(linears):
        h = h @ w.T + b[None, :]
        if li < len(lns):
            h = jnp.maximum(h, 0.0)
            g, bt = lns[li]
            mean = jnp.mean(h, axis=-1, keepdims=True)
            var = jnp.mean((h - mean) ** 2, axis=-1, keepdims=True)
            h = (h - mean) / jnp.sqrt(var + LN_EPS) * g[None, :] + bt[None, :]
    return jax.nn.sigmoid(h)


if __name__ == "__main__":
    key = jax.random.PRNGKey(0)
    k_x, k_p, k_ln = jax.random.split(key, 3)

    batch, feature_dim = 256, 8
    x = jax.random.normal(k_x, (batch, feature_dim), dtype=jnp.float32)
    params = init_params(k_p, feature_dim)

    out = jax.block_until_ready(fault_prediction_gnn(x, params))
    assert out.shape == (batch, 1)
    assert bool(jnp.all(jnp.isfinite(out)))
    assert bool(jnp.all((out >= 0.0) & (out <= 1.0)))
    ref = reference_forward(x, params)
    assert bool(jnp.max(jnp.abs(out - ref)) < 5e-2), "mismatch vs f32 reference"

    # Second check with non-trivial LayerNorm affine params so the gamma/beta ->
    # next-Linear folding is actually exercised.
    lns2 = []
    for i, feat in enumerate((32, 16, 8)):
        kg, kb = jax.random.split(jax.random.fold_in(k_ln, i))
        gamma = 1.0 + 0.3 * jax.random.normal(kg, (feat,), dtype=jnp.float32)
        beta = 0.2 * jax.random.normal(kb, (feat,), dtype=jnp.float32)
        lns2.append((gamma, beta))
    params2 = {"linears": params["linears"], "lns": lns2}
    out2 = jax.block_until_ready(fault_prediction_gnn(x, params2))
    ref2 = reference_forward(x, params2)
    assert bool(jnp.max(jnp.abs(out2 - ref2)) < 5e-2), "mismatch with folded LN affine"

    print("KERNEL_OK")
</pallas_src>

<mosaic_0001>
module attributes {stable_mosaic.version = 11 : i64} {
  func.func @mlp_kernel(%arg0: i32, %arg1: memref<128x8xf32, #tpu.memory_space<vmem>>, %arg2: memref<32x8xf32, #tpu.memory_space<vmem>>, %arg3: memref<16x32xbf16, #tpu.memory_space<vmem>>, %arg4: memref<8x16xbf16, #tpu.memory_space<vmem>>, %arg5: memref<8x1xf32, #tpu.memory_space<vmem>>, %arg6: memref<32x4xf32, #tpu.memory_space<vmem>>, %arg7: memref<1x128xf32, #tpu.memory_space<vmem>>) attributes {dimension_semantics = [#tpu.dimension_semantics<parallel>], iteration_bounds = array<i64: 2>, scalar_prefetch = 0 : i64, scratch_operands = 0 : i64, tpu.core_type = #tpu.core_type<tc>, window_params = [{transform_indices = @transform_0, window_bounds = array<i64: 128, 8>}, {pipeline_mode = #tpu.pipeline_mode<synchronous>, transform_indices = @transform_1, window_bounds = array<i64: 32, 8>}, {pipeline_mode = #tpu.pipeline_mode<synchronous>, transform_indices = @transform_2, window_bounds = array<i64: 16, 32>}, {pipeline_mode = #tpu.pipeline_mode<synchronous>, transform_indices = @transform_3, window_bounds = array<i64: 8, 16>}, {pipeline_mode = #tpu.pipeline_mode<synchronous>, transform_indices = @transform_4, window_bounds = array<i64: 8, 1>}, {pipeline_mode = #tpu.pipeline_mode<synchronous>, transform_indices = @transform_5, window_bounds = array<i64: 32, 4>}, {transform_indices = @transform_6, window_bounds = array<i64: 1, 128>}]} {
    %c0 = arith.constant 0 : index
    %c0_0 = arith.constant 0 : index
    %0 = vector.load %arg2[%c0, %c0_0] : memref<32x8xf32, #tpu.memory_space<vmem>>, vector<32x8xf32>
    %c0_1 = arith.constant 0 : index
    %c0_2 = arith.constant 0 : index
    %1 = vector.load %arg1[%c0_1, %c0_2] : memref<128x8xf32, #tpu.memory_space<vmem>>, vector<128x8xf32>
    %2 = tpu.transpose %1, [1, 0] : vector<128x8xf32> -> vector<8x128xf32>
    %cst = arith.constant dense<0.000000e+00> : vector<32x128xf32>
    %3 = tpu.matmul %0, %2, %cst {dimension_numbers = #tpu.dot_dimension_numbers<[1], [0], [0], [1], [0, 0, 1, 1], [], []>} : vector<32x8xf32>, vector<8x128xf32>, vector<32x128xf32> -> vector<32x128xf32>
    %c0_3 = arith.constant 0 : index
    %c0_4 = arith.constant 0 : index
    %4 = vector.load %arg6[%c0_3, %c0_4] : memref<32x4xf32, #tpu.memory_space<vmem>>, vector<32x1xf32>
    %5 = vector.broadcast %4 : vector<32x1xf32> to vector<32x128xf32>
    %6 = arith.addf %3, %5 : vector<32x128xf32>
    %cst_5 = arith.constant 0.000000e+00 : f32
    %7 = vector.broadcast %cst_5 : f32 to vector<32x128xf32>
    %8 = arith.maximumf %6, %7 : vector<32x128xf32>
    %cst_6 = arith.constant dense<0.000000e+00> : vector<128xf32>
    %9 = vector.multi_reduction <add>, %8, %cst_6 [0] : vector<32x128xf32> to vector<128xf32>
    %10 = vector.shape_cast %9 : vector<128xf32> to vector<1x128xf32>
    %cst_7 = arith.constant 3.200000e+01 : f32
    %11 = vector.broadcast %cst_7 : f32 to vector<1x128xf32>
    %12 = arith.divf %10, %11 : vector<1x128xf32>
    %13 = arith.mulf %8, %8 : vector<32x128xf32>
    %cst_8 = arith.constant dense<0.000000e+00> : vector<128xf32>
    %14 = vector.multi_reduction <add>, %13, %cst_8 [0] : vector<32x128xf32> to vector<128xf32>
    %15 = vector.shape_cast %14 : vector<128xf32> to vector<1x128xf32>
    %cst_9 = arith.constant 3.200000e+01 : f32
    %16 = vector.broadcast %cst_9 : f32 to vector<1x128xf32>
    %17 = arith.divf %15, %16 : vector<1x128xf32>
    %18 = arith.mulf %12, %12 : vector<1x128xf32>
    %19 = arith.subf %17, %18 : vector<1x128xf32>
    %cst_10 = arith.constant 0.000000e+00 : f32
    %20 = vector.broadcast %cst_10 : f32 to vector<1x128xf32>
    %21 = arith.maximumf %19, %20 : vector<1x128xf32>
    %22 = vector.broadcast %12 : vector<1x128xf32> to vector<32x128xf32>
    %23 = arith.subf %8, %22 : vector<32x128xf32>
    %cst_11 = arith.constant 9.99999974E-6 : f32
    %24 = vector.broadcast %cst_11 : f32 to vector<1x128xf32>
    %25 = arith.addf %21, %24 : vector<1x128xf32>
    %26 = math.rsqrt %25 : vector<1x128xf32>
    %27 = vector.broadcast %26 : vector<1x128xf32> to vector<32x128xf32>
    %28 = arith.mulf %23, %27 : vector<32x128xf32>
    %c0_12 = arith.constant 0 : index
    %c0_13 = arith.constant 0 : index
    %29 = vector.load %arg3[%c0_12, %c0_13] : memref<16x32xbf16, #tpu.memory_space<vmem>>, vector<16x32xbf16>
    %30 = arith.truncf %28 : vector<32x128xf32> to vector<32x128xbf16>
    %cst_14 = arith.constant dense<0.000000e+00> : vector<16x128xf32>
    %31 = tpu.matmul %29, %30, %cst_14 {dimension_numbers = #tpu.dot_dimension_numbers<[1], [0], [0], [1], [0, 0, 1, 1], [], []>} : vector<16x32xbf16>, vector<32x128xbf16>, vector<16x128xf32> -> vector<16x128xf32>
    %c0_15 = arith.constant 0 : index
    %c1 = arith.constant 1 : index
    %32 = vector.load %arg6[%c0_15, %c1] : memref<32x4xf32, #tpu.memory_space<vmem>>, vector<16x1xf32>
    %33 = vector.broadcast %32 : vector<16x1xf32> to vector<16x128xf32>
    %34 = arith.addf %31, %33 : vector<16x128xf32>
    %cst_16 = arith.constant 0.000000e+00 : f32
    %35 = vector.broadcast %cst_16 : f32 to vector<16x128xf32>
    %36 = arith.maximumf %34, %35 : vector<16x128xf32>
    %cst_17 = arith.constant dense<0.000000e+00> : vector<128xf32>
    %37 = vector.multi_reduction <add>, %36, %cst_17 [0] : vector<16x128xf32> to vector<128xf32>
    %38 = vector.shape_cast %37 : vector<128xf32> to vector<1x128xf32>
    %cst_18 = arith.constant 1.600000e+01 : f32
    %39 = vector.broadcast %cst_18 : f32 to vector<1x128xf32>
    %40 = arith.divf %38, %39 : vector<1x128xf32>
    %41 = arith.mulf %36, %36 : vector<16x128xf32>
    %cst_19 = arith.constant dense<0.000000e+00> : vector<128xf32>
    %42 = vector.multi_reduction <add>, %41, %cst_19 [0] : vector<16x128xf32> to vector<128xf32>
    %43 = vector.shape_cast %42 : vector<128xf32> to vector<1x128xf32>
    %cst_20 = arith.constant 1.600000e+01 : f32
    %44 = vector.broadcast %cst_20 : f32 to vector<1x128xf32>
    %45 = arith.divf %43, %44 : vector<1x128xf32>
    %46 = arith.mulf %40, %40 : vector<1x128xf32>
    %47 = arith.subf %45, %46 : vector<1x128xf32>
    %cst_21 = arith.constant 0.000000e+00 : f32
    %48 = vector.broadcast %cst_21 : f32 to vector<1x128xf32>
    %49 = arith.maximumf %47, %48 : vector<1x128xf32>
    %50 = vector.broadcast %40 : vector<1x128xf32> to vector<16x128xf32>
    %51 = arith.subf %36, %50 : vector<16x128xf32>
    %cst_22 = arith.constant 9.99999974E-6 : f32
    %52 = vector.broadcast %cst_22 : f32 to vector<1x128xf32>
    %53 = arith.addf %49, %52 : vector<1x128xf32>
    %54 = math.rsqrt %53 : vector<1x128xf32>
    %55 = vector.broadcast %54 : vector<1x128xf32> to vector<16x128xf32>
    %56 = arith.mulf %51, %55 : vector<16x128xf32>
    %c0_23 = arith.constant 0 : index
    %c0_24 = arith.constant 0 : index
    %57 = vector.load %arg4[%c0_23, %c0_24] : memref<8x16xbf16, #tpu.memory_space<vmem>>, vector<8x16xbf16>
    %58 = arith.truncf %56 : vector<16x128xf32> to vector<16x128xbf16>
    %cst_25 = arith.constant dense<0.000000e+00> : vector<8x128xf32>
    %59 = tpu.matmul %57, %58, %cst_25 {dimension_numbers = #tpu.dot_dimension_numbers<[1], [0], [0], [1], [0, 0, 1, 1], [], []>} : vector<8x16xbf16>, vector<16x128xbf16>, vector<8x128xf32> -> vector<8x128xf32>
    %c0_26 = arith.constant 0 : index
    %c2 = arith.constant 2 : index
    %60 = vector.load %arg6[%c0_26, %c2] : memref<32x4xf32, #tpu.memory_space<vmem>>, vector<8x1xf32>
    %61 = vector.broadcast %60 : vector<8x1xf32> to vector<8x128xf32>
    %62 = arith.addf %59, %61 : vector<8x128xf32>
    %cst_27 = arith.constant 0.000000e+00 : f32
    %63 = vector.broadcast %cst_27 : f32 to vector<8x128xf32>
    %64 = arith.maximumf %62, %63 : vector<8x128xf32>
    %cst_28 = arith.constant dense<0.000000e+00> : vector<128xf32>
    %65 = vector.multi_reduction <add>, %64, %cst_28 [0] : vector<8x128xf32> to vector<128xf32>
    %66 = vector.shape_cast %65 : vector<128xf32> to vector<1x128xf32>
    %cst_29 = arith.constant 8.000000e+00 : f32
    %67 = vector.broadcast %cst_29 : f32 to vector<1x128xf32>
    %68 = arith.divf %66, %67 : vector<1x128xf32>
    %69 = arith.mulf %64, %64 : vector<8x128xf32>
    %cst_30 = arith.constant dense<0.000000e+00> : vector<128xf32>
    %70 = vector.multi_reduction <add>, %69, %cst_30 [0] : vector<8x128xf32> to vector<128xf32>
    %71 = vector.shape_cast %70 : vector<128xf32> to vector<1x128xf32>
    %cst_31 = arith.constant 8.000000e+00 : f32
    %72 = vector.broadcast %cst_31 : f32 to vector<1x128xf32>
    %73 = arith.divf %71, %72 : vector<1x128xf32>
    %74 = arith.mulf %68, %68 : vector<1x128xf32>
    %75 = arith.subf %73, %74 : vector<1x128xf32>
    %cst_32 = arith.constant 0.000000e+00 : f32
    %76 = vector.broadcast %cst_32 : f32 to vector<1x128xf32>
    %77 = arith.maximumf %75, %76 : vector<1x128xf32>
    %78 = vector.broadcast %68 : vector<1x128xf32> to vector<8x128xf32>
    %79 = arith.subf %64, %78 : vector<8x128xf32>
    %cst_33 = arith.constant 9.99999974E-6 : f32
    %80 = vector.broadcast %cst_33 : f32 to vector<1x128xf32>
    %81 = arith.addf %77, %80 : vector<1x128xf32>
    %82 = math.rsqrt %81 : vector<1x128xf32>
    %83 = vector.broadcast %82 : vector<1x128xf32> to vector<8x128xf32>
    %84 = arith.mulf %79, %83 : vector<8x128xf32>
    %c0_34 = arith.constant 0 : index
    %c0_35 = arith.constant 0 : index
    %85 = vector.load %arg5[%c0_34, %c0_35] : memref<8x1xf32, #tpu.memory_space<vmem>>, vector<8x1xf32>
    %86 = vector.broadcast %85 : vector<8x1xf32> to vector<8x128xf32>
    %87 = arith.mulf %84, %86 : vector<8x128xf32>
    %cst_36 = arith.constant dense<0.000000e+00> : vector<128xf32>
    %88 = vector.multi_reduction <add>, %87, %cst_36 [0] : vector<8x128xf32> to vector<128xf32>
    %89 = vector.shape_cast %88 : vector<128xf32> to vector<1x128xf32>
    %c0_37 = arith.constant 0 : index
    %c3 = arith.constant 3 : index
    %90 = vector.load %arg6[%c0_37, %c3] : memref<32x4xf32, #tpu.memory_space<vmem>>, vector<1x1xf32>
    %91 = vector.broadcast %90 : vector<1x1xf32> to vector<1x128xf32>
    %92 = arith.addf %89, %91 : vector<1x128xf32>
    %93 = arith.negf %92 : vector<1x128xf32>
    %94 = math.exp %93 : vector<1x128xf32>
    %cst_38 = arith.constant 1.000000e+00 : f32
    %95 = vector.broadcast %cst_38 : f32 to vector<1x128xf32>
    %96 = arith.addf %95, %94 : vector<1x128xf32>
    %97 = arith.divf %95, %96 : vector<1x128xf32>
    %c0_39 = arith.constant 0 : index
    %c0_40 = arith.constant 0 : index
    %98 = vector.load %arg7[%c0_39, %c0_40] : memref<1x128xf32, #tpu.memory_space<vmem>>, vector<1x128xf32>
    tpu.vector_store %arg7[%c0_39, %c0_40], %97 {strides = array<i32>} : memref<1x128xf32, #tpu.memory_space<vmem>>, vector<1x128xf32>,
    return
  }
  func.func @transform_0(%arg0: i32) -> (i32, i32) {
    %c0_i32 = arith.constant 0 : i32
    %c0_i32_0 = arith.constant 0 : i32
    return %arg0, %c0_i32 : i32, i32
  }
  func.func @transform_1(%arg0: i32) -> (i32, i32) {
    %c0_i32 = arith.constant 0 : i32
    %c0_i32_0 = arith.constant 0 : i32
    %c0_i32_1 = arith.constant 0 : i32
    return %c0_i32, %c0_i32_0 : i32, i32
  }
  func.func @transform_2(%arg0: i32) -> (i32, i32) {
    %c0_i32 = arith.constant 0 : i32
    %c0_i32_0 = arith.constant 0 : i32
    %c0_i32_1 = arith.constant 0 : i32
    return %c0_i32, %c0_i32_0 : i32, i32
  }
  func.func @transform_3(%arg0: i32) -> (i32, i32) {
    %c0_i32 = arith.constant 0 : i32
    %c0_i32_0 = arith.constant 0 : i32
    %c0_i32_1 = arith.constant 0 : i32
    return %c0_i32, %c0_i32_0 : i32, i32
  }
  func.func @transform_4(%arg0: i32) -> (i32, i32) {
    %c0_i32 = arith.constant 0 : i32
    %c0_i32_0 = arith.constant 0 : i32
    %c0_i32_1 = arith.constant 0 : i32
    return %c0_i32, %c0_i32_0 : i32, i32
  }
  func.func @transform_5(%arg0: i32) -> (i32, i32) {
    %c0_i32 = arith.constant 0 : i32
    %c0_i32_0 = arith.constant 0 : i32
    %c0_i32_1 = arith.constant 0 : i32
    return %c0_i32, %c0_i32_0 : i32, i32
  }
  func.func @transform_6(%arg0: i32) -> (i32, i32) {
    %c0_i32 = arith.constant 0 : i32
    %c0_i32_0 = arith.constant 0 : i32
    return %c0_i32, %arg0 : i32, i32
  }
}

</mosaic_0001>

<bundles_post_ra>
// kernel: tpu_custom_call.1
= control target key start
LH: loop header
LB: loop body
LE: loop exit
PB: predicated region body
PF: predicated region fallthrough
CT: control target
= control target key end

     0   :  { %11 = vsyncpa [#allocation3], 0  ;;  %s1289_s0 = inlined_call_operand.vmem [shape: f32[256,8], index: 0, kind: input, shape index: {}]   ;;  %s1290_s1 = inlined_call_operand.vmem [shape: f32[32,8], index: 1, kind: input, shape index: {}]   ;;  %s1291_s2 = inlined_call_operand.vmem [shape: bf16[16,32], index: 2, kind: input, shape index: {}]   ;;  %s1292_s3 = inlined_call_operand.vmem [shape: bf16[8,16], index: 3, kind: input, shape index: {}]   ;;  %s1293_s4 = inlined_call_operand.vmem [shape: f32[8,1], index: 4, kind: input, shape index: {}]   ;;  %s1294_s5 = inlined_call_operand.vmem [shape: f32[32,4], index: 5, kind: input, shape index: {}]   ;;  %s1295_s6 = inlined_call_operand.hbm [shape: f32[1,256], index: 6, kind: output, shape index: {}]  }
   0x1   :  { %13 = vsyncpa [#allocation3 + $0x1], 0  ;;  %s1079_s21 = smov 0   ;;  %s1081_s22 = smov 0  }
   0x2   :  { %s1083_s23 = smov 0   ;;  %s1085_s24 = smov 0  }
   0x3 LB: > { %s750_s25 = sadd.s32 4294967295, %s1035_s24   ;;  %s751_s26 = sadd.s32 4294967294, %s1035_s24   ;;  %s1035_s24 = sphi %s1085_s24, %s1303_s24   ;;  %s1031_s23 = sphi %s1083_s23, %s1302_s23   ;;  %s1027_s22 = sphi %s1081_s22, %s1301_s22   ;;  %s1023_s21 = sphi %s1079_s21, %s1300_s21  }
   0x4   : > { %s1102_s27 = sadd.s32 1, %s1035_s24   ;;  %s157_s28 = sadd.s32 1, %s1031_s23 }
   0x5   : > { %s154_s29 = ssub.s32 %s1035_s24, %s1102_s27  ;;  %p167_p0 = scmp.ne.s32.totalorder %s1031_s23, %s1027_s22 }
   0x6   : > { %p155_p1 = scmp.eq.s32.totalorder %s154_s29, 0  ;;  %p168_p2 = scmp.eq.s32.totalorder %s750_s25, 1 }
   0x7   : > { %p173_p3 = scmp.ne.s32.totalorder %s1027_s22, %s1023_s21  ;;  %p174_p4 = scmp.eq.s32.totalorder %s751_s26, 1 }
   0x8   : > { %s1112_s30 = scalar_select %p155_p1, %s1031_s23, %s157_s28  }
   0x9   : > { %p1114_p5 = por %p168_p2, %p167_p0  ;;  %p1118_p6 = por %p174_p4, %p173_p3 }
   0xa   : > { %p754_p7 = scmp.ge.s32.totalorder %s1035_s24, 1  ;;  %p216_p8 = scmp.lt.s32.totalorder %s1035_s24, 3 }
   0xc   : > { %p217_p9 = pnand %p754_p7, %p216_p8 }
   0xd   : > { %s1124_s9 = sshll.u32 (!%p217_p9), %s750_s25, 4  ;;  %vm296_vm0 = vcmask (!%p217_p9), 64512   ;;  %v252_v0 = vld [vmem:[%s1290_s1] sm:$0xff] (!%p217_p9)  ;;  %v1037_v1 = vmov (!%p217_p9), 0   ;;  %v274_v3 = vld [vmem:[%s1294_s5 + $0x10] sm:$0xff] (!%p217_p9)  ;;  %v273_v4 = vld [vmem:[%s1294_s5 + $0x8] sm:$0xff] (!%p217_p9) }
   0xe   : > { %220 = sbr.rel (%p217_p9) target bundleno = 928 (0x3a0), region = 44  ;;  %p246_p10 = scmp.lt.s32.totalorder (!%p217_p9), %s1124_s9, 31  ;;  %841 = vmatprep.mubr.msk.f32.mxu0 (!%p217_p9), %vm296_vm0, %v252_v0  ;;  %954 = vset.pattern.permute.xlu0 (!%p217_p9), %v1037_v1  ;;  %v1135_v2 = vld [vmem:[%s1294_s5] sm:$0xff] (!%p217_p9)  ;;  %v275_v5 = vld [vmem:[%s1294_s5 + $0x18] sm:$0xff] (!%p217_p9)  ;;  %vm1156_vm1 = vmpackc.low (!%p217_p9), %vm296_vm0, %vm296_vm0  ;;  %v1038_v34 = vmov (!%p217_p9), 0.0   ;;  %vm1039_vm2 = vmmov (!%p217_p9), 0  }
   0xf   : > { %278 = vperm.xlu0 (!%p217_p9), %954, %v1135_v2   ;;  %955 = vset.pattern.permute.xlu1 (!%p217_p9), %v1037_v1  ;;  %v253_v31 = vld [vmem:[%s1290_s1 + $0x8] sm:$0xff] (!%p217_p9)  ;;  %v254_v32 = vld [vmem:[%s1290_s1 + $0x10] sm:$0xff] (!%p217_p9)  ;;  %v255_v33 = vld [vmem:[%s1290_s1 + $0x18] sm:$0xff] (!%p217_p9)  ;;  %v1040_v35 = vmov (!%p217_p9), 1   ;;  %vm505_vm3 = vcmask (!%p217_p9), 261120   ;;  %vm588_vm4 = vcmask (!%p217_p9), 130048   ;;  %s1247_s14 = scalar_lea.hbm (!%p217_p9), %s1295_s6, %s1124_s9 }
  0x10   : > { %288 = vperm.xlu1 (!%p217_p9), %955, %v274_v3   ;;  %847 = vmatprep.subr.bf16.mxu1 (!%p217_p9), %v1038_v34  ;;  %s1043_s17 = smov (!%p217_p9), [#allocation2]  }
  0x11   : > { %851 = vmatprep.mubr.msk.bf16.mxu1 (!%p217_p9), %vm1039_vm2, %v1038_v34  ;;  %s977_s18 = sshll.u32 (!%p217_p9), %s1043_s17, 4  ;;  %s978_s18 = int_to_ptr.vmem [resolvable:$false] %s977_s18 }
  0x12   : > { %s979_s19 = scalar_lea.vmem (!%p217_p9), %s978_s18, 32 }
  0x13   : > { %283 = vperm.xlu0 (!%p217_p9), %954, %v273_v4  }
  0x14   : > { %293 = vperm.xlu1 (!%p217_p9), %955, %v275_v5  }
  0x15   : > { %s247_s16 = scalar_select %p246_p10, %s1124_s9, 31 }
  0x17   : > { %s756_s25 = sshll.u32 %s247_s16, 3  ;;  %956 = vset.pattern.permute.xlu0 %v1040_v35 }
  0x18   : > { %s1152_s29 = scalar_lea.vmem %s1289_s0, %s756_s25  ;;  %957 = vset.pattern.permute.xlu1 %v1040_v35  ;;  %492 = vperm.xlu0 %956, %v1135_v2  }
  0x19   : > { %v256_v7 = vld [vmem:[%s1152_s29] sm:$0xff]  ;;  %v257_v8 = vld [vmem:[%s1152_s29 + $0x8] sm:$0xff]  ;;  %v258_v9 = vld [vmem:[%s1152_s29 + $0x10] sm:$0xff]  ;;  %497 = vperm.xlu1 %957, %v273_v4  }
  0x1a   : > { %v861_v10 = vpack.c.bf16 %v257_v8, %v256_v7  ;;  %v259_v11 = vld [vmem:[%s1152_s29 + $0x18] sm:$0xff]  ;;  %v260_v13 = vld [vmem:[%s1152_s29 + $0x20] sm:$0xff]  ;;  %v261_v14 = vld [vmem:[%s1152_s29 + $0x28] sm:$0xff] }
  0x1b   : > { %v867_v12 = vpack.c.bf16 %v259_v11, %v258_v9  ;;  %v873_v15 = vpack.c.bf16 %v261_v14, %v260_v13  ;;  %v262_v16 = vld [vmem:[%s1152_s29 + $0x30] sm:$0xff]  ;;  %v263_v17 = vld [vmem:[%s1152_s29 + $0x38] sm:$0xff]  ;;  %v264_v19 = vld [vmem:[%s1152_s29 + $0x40] sm:$0xff] }
  0x1c   : > { %863 = vmatprep.subr.msk.bf16.mxu0 %vm1156_vm1, %v861_v10  ;;  %v879_v18 = vpack.c.bf16 %v263_v17, %v262_v16  ;;  %v265_v20 = vld [vmem:[%s1152_s29 + $0x48] sm:$0xff]  ;;  %v266_v22 = vld [vmem:[%s1152_s29 + $0x50] sm:$0xff]  ;;  %v267_v23 = vld [vmem:[%s1152_s29 + $0x58] sm:$0xff]  ;;  %959 = vset.pattern.permute.xlu0 %v1037_v1 }
  0x1d   : > { %866 = vmatpush3.bf16.xpose.msk.msra.mxu0 %vm1156_vm1, %v861_v10  ;;  %v885_v21 = vpack.c.bf16 %v265_v20, %v264_v19  ;;  %v891_v24 = vpack.c.bf16 %v267_v23, %v266_v22  ;;  %v268_v25 = vld [vmem:[%s1152_s29 + $0x60] sm:$0xff]  ;;  %v269_v26 = vld [vmem:[%s1152_s29 + $0x68] sm:$0xff]  ;;  %v270_v28 = vld [vmem:[%s1152_s29 + $0x70] sm:$0xff] }
  0x1e   : > { %869 = vmatprep.subr.msk.bf16.mxu0 %vm1156_vm1, %v867_v12  ;;  %v897_v27 = vpack.c.bf16 %v269_v26, %v268_v25  ;;  %v271_v29 = vld [vmem:[%s1152_s29 + $0x78] sm:$0xff]  ;;  %s243_s29 = sand.u32 1, %s1027_s22  }
  0x1f   : > { %v903_v30 = vpack.c.bf16 %v271_v29, %v270_v28  ;;  %v962_v28 = vld [vmem:[%s1291_s2] sm:$0xff]   ;;  %s244_s10 = scalar_lea.vmem [#allocation2], %s243_s29  ;;  %s684_s15 = scalar_lea.sflag [#allocation3], %s243_s29 }
  0x20   : > { %v656_v29 = vld [vmem:[%s1293_s4] sm:$0xff]  ;;  %s696_s11 = sshll.u32 %s244_s10, 4  ;;  %s1249_s11 = int_to_ptr.vmem [resolvable:$true] %s696_s11 }
  0x21   : > { %659 = vperm.xlu0 %959, %v656_v29   ;;  %s973_s16 = scalar_lea.vmem %s1249_s11, 16  ;;  %p980_p0 = scmp.lt.s32.totalorder %s1249_s11, %s978_s18 }
  0x22   : > { %p974_p11 = scmp.ne.s32.totalorder %s1249_s11, %s973_s16  ;;  %p981_p1 = scmp.lt.s32.totalorder %s979_s19, %s973_s16 }
  0x24   : > { %p975_p12 = pnand %p974_p11, %p1114_p5  ;;  %p982_p2 = por %p981_p1, %p980_p0 }
  0x25   : > { %872 = vmatpush3.bf16.xpose.msk.msra.mxu0 %vm1156_vm1, %v867_v12 }
  0x26   : > { %875 = vmatprep.subr.msk.bf16.mxu0 %vm1156_vm1, %v873_v15  ;;  %p976_p13 = pneg %p975_p12 }
  0x28   : > { %p983_p3 = pnand %p982_p2, %p976_p13 }
  0x2d   : > { %878 = vmatpush3.bf16.xpose.msk.msra.mxu0 %vm1156_vm1, %v873_v15 }
  0x2e   : > { %881 = vmatprep.subr.msk.bf16.mxu0 %vm1156_vm1, %v879_v18 }
  0x35   : > { %884 = vmatpush3.bf16.xpose.msk.msra.mxu0 %vm1156_vm1, %v879_v18 }
  0x36   : > { %887 = vmatprep.subr.msk.bf16.mxu0 %vm1156_vm1, %v885_v21 }
  0x3d   : > { %890 = vmatpush3.bf16.xpose.msk.msra.mxu0 %vm1156_vm1, %v885_v21 }
  0x3e   : > { %893 = vmatprep.subr.msk.bf16.mxu0 %vm1156_vm1, %v891_v24 }
  0x45   : > { %896 = vmatpush3.bf16.xpose.msk.msra.mxu0 %vm1156_vm1, %v891_v24 }
  0x46   : > { %899 = vmatprep.subr.msk.bf16.mxu0 %vm1156_vm1, %v897_v27 }
  0x4d   : > { %902 = vmatpush3.bf16.xpose.msk.msra.mxu0 %vm1156_vm1, %v897_v27 }
  0x4e   : > { %905 = vmatprep.subr.msk.bf16.mxu0 %vm1156_vm1, %v903_v30 }
  0x55   : > { %908 = vmatpush3.bf16.xpose.msk.msra.mxu0 %vm1156_vm1, %v903_v30  ;;  %v1041_v30 = vmov 2  }
  0x56   : > { %958 = vset.pattern.permute.xlu1 %v1041_v30 }
  0x57   : > { %585 = vperm.xlu1 %958, %v1135_v2  }
  0x5c   : > { %842 = vmatmul.mubr.msk.f32.vlgmr.msra.gmra.mrb[0].mxu0 %vm296_vm0, %v253_v31  ;;  %v669_v31 = vld [vmem:[%s1294_s5] sm:$0x1] }
  0x5d   : > { %844 = vmatprep.mubr.msk.f32.mxu0 %vm296_vm0, %v254_v32  ;;  %v1042_v32 = vmov 3  }
  0x5e   : > { %961 = vset.pattern.permute.xlu0 %v1042_v32  ;;  %960 = vset.pattern.permute.xlu1 %v1042_v32 }
  0x5f   : > { %672 = vperm.xlu1 %960, %v669_v31  }
  0x60   : > { %845 = vmatmul.mubr.msk.f32.gmra.mrb[2].mxu0 %vm296_vm0, %v255_v33 }
  0x8e   : > { %v279_v36 = vpop.permute.xlu0 %278 }
  0x8f   : > { %v289_v37 = vpop.permute.xlu1 %288 }
  0x92   : > { %v284_v38 = vpop.permute.xlu0 %283 }
  0x93   : > { %v294_v43 = vpop.permute.xlu1 %293 }
  0x97   : > { %v493_v33 = vpop.permute.xlu0 %492 }
 0x12f   : > { %v843_v39 = vpop.f32.mrb[0].mxu0 }
 0x130   : > { %v429_v40 = vadd.f32 %v843_v39, %v284_v38  ;;  %v423_v41 = vpop.f32.mrb[1].mxu0 }
 0x131   : > { %v424_v42 = vadd.f32 %v423_v41, %v279_v36 }
 0x132   : > { %v443_v44 = vmax.f32 %v429_v40, 0.0 }
 0x133   : > { %v442_v45 = vmax.f32 %v424_v42, 0.0  ;;  %v846_v46 = vpop.f32.mrb[2].mxu0 }
 0x134   : > { %v458_v47 = vmul.f32 %v443_v44, %v443_v44  ;;  %v439_v48 = vadd.f32 %v846_v46, %v294_v43  ;;  %v433_v49 = vpop.f32.mrb[3].mxu0 }
 0x135   : > { %v446_v50 = vadd.f32 %v443_v44, %v442_v45  ;;  %v457_v51 = vmul.f32 %v442_v45, %v442_v45  ;;  %v434_v52 = vadd.f32 %v433_v49, %v289_v37 }
 0x136   : > { %v445_v54 = vmax.f32 %v439_v48, 0.0 }
 0x137   : > { %v461_v53 = vadd.f32 %v458_v47, %v457_v51  ;;  %v444_v55 = vmax.f32 %v434_v52, 0.0 }
 0x138   : > { %v460_v58 = vmul.f32 %v445_v54, %v445_v54 }
 0x139   : > { %v447_v56 = vadd.f32 %v446_v50, %v444_v55  ;;  %v459_v57 = vmul.f32 %v444_v55, %v444_v55 }
 0x13b   : > { %v448_v59 = vadd.f32 %v447_v56, %v445_v54  ;;  %v462_v60 = vadd.f32 %v461_v53, %v459_v57 }
 0x13d   : > { %v449_v61 = vrot.slane %v448_v59, 4  ;;  %v463_v62 = vadd.f32 %v462_v60, %v460_v58 }
 0x13f   : > { %v450_v63 = vadd.f32 %v449_v61, %v448_v59  ;;  %v464_v0 = vrot.slane %v463_v62, 4 }
 0x141   : > { %v451_v1 = vrot.slane %v450_v63, 2  ;;  %v465_v3 = vadd.f32 %v464_v0, %v463_v62 }
 0x143   : > { %v452_v4 = vadd.f32 %v451_v1, %v450_v63  ;;  %v466_v5 = vrot.slane %v465_v3, 2 }
 0x145   : > { %v453_v6 = vrot.slane %v452_v4, 1  ;;  %v467_v7 = vadd.f32 %v466_v5, %v465_v3 }
 0x147   : > { %v454_v8 = vadd.f32 %v453_v6, %v452_v4  ;;  %v468_v9 = vrot.slane %v467_v7, 1 }
 0x149   : > { %v456_v10 = vmul.f32 0.03125, %v454_v8  ;;  %v469_v11 = vadd.f32 %v468_v9, %v467_v7  ;;  %v580_v7 = vld [vmem:[%s1292_s3] sm:$0xf] }
 0x14b   : > { %v470_v12 = vmul.f32 0.03125, %v469_v11  ;;  %v471_v13 = vmul.f32 %v456_v10, %v456_v10  ;;  %v476_v14 = vsub.f32 %v444_v55, %v456_v10  ;;  %v474_v15 = vsub.f32 %v442_v45, %v456_v10 }
 0x14c   : > { %v475_v16 = vsub.f32 %v443_v44, %v456_v10  ;;  %v477_v17 = vsub.f32 %v445_v54, %v456_v10 }
 0x14d   : > { %v472_v18 = vsub.f32 %v470_v12, %v471_v13 }
 0x14f   : > { %v473_v19 = vmax.f32 %v472_v18, 0.0 }
 0x151   : > { %v478_v20 = vadd.f32 1e-05, %v473_v19 }
 0x153   : > { %963 = vrsqrt.f32 %v478_v20 }
 0x15d   : > { %v964_v21 = vpop.eup %963 }
 0x15e   : > { %v480_v22 = vmul.f32 %v964_v21, %v474_v15  ;;  %v481_v23 = vmul.f32 %v964_v21, %v475_v16  ;;  %v482_v24 = vmul.f32 %v964_v21, %v476_v14  ;;  %v483_v25 = vmul.f32 %v964_v21, %v477_v17 }
 0x160   : > { %v486_v26 = vpack.c.bf16 %v481_v23, %v480_v22  ;;  %v487_v27 = vpack.c.bf16 %v483_v25, %v482_v24 }
 0x162   : > { %848 = vmatpush3.bf16.msra.mxu1 %v486_v26 }
 0x163   : > { %849 = vmatprep.subr.bf16.mxu1 %v1038_v34 }
 0x166   : > { %850 = vmatpush3.bf16.msra.mxu1 %v487_v27 }
 0x167   : > { %855 = vmatprep.subr.bf16.mxu1 %v1038_v34 }
 0x169   : > { %852 = vmatmul.mubr.msk.bf16.vlgmr.msra.gmra.mrb[0].mxu1 %vm505_vm3, %v962_v28 }
 0x16a   : > { %857 = vmatprep.mubr.msk.bf16.mxu1 %vm1039_vm2, %v1038_v34  ;;  %v498_v34 = vpop.permute.xlu1 %497 }
 0x16e   : > { %v586_v8 = vpop.permute.xlu1 %585 }
 0x23c   : > { %v543_v35 = vpop.f32.mrb[0].mxu1 }
 0x23d   : > { %v544_v36 = vadd.f32 %v543_v35, %v493_v33  ;;  %v853_v37 = vpop.f32.mrb[1].mxu1 }
 0x23e   : > { %v546_v38 = vpop.f32.mrb[2].mxu1 }
 0x23f   : > { %v550_v39 = vmax.f32 %v544_v36, 0.0  ;;  %v547_v40 = vadd.f32 %v546_v38, %v498_v34  ;;  %v854_v41 = vpop.f32.mrb[3].mxu1  ;;  %v660_v36 = vpop.permute.xlu0 %659 }
 0x241   : > { %v551_v42 = vmax.f32 %v547_v40, 0.0  ;;  %v561_v43 = vmul.f32 %v550_v39, %v550_v39 }
 0x243   : > { %v552_v2 = vadd.f32 %v551_v42, %v550_v39  ;;  %v562_v44 = vmul.f32 %v551_v42, %v551_v42 }
 0x245   : > { %v553_v45 = vrot.slane %v552_v2, 4  ;;  %v563_v46 = vadd.f32 %v562_v44, %v561_v43 }
 0x247   : > { %v554_v47 = vadd.f32 %v553_v45, %v552_v2  ;;  %v564_v48 = vrot.slane %v563_v46, 4  ;;  %v673_v2 = vpop.permute.xlu1 %672 }
 0x249   : > { %v555_v49 = vrot.slane %v554_v47, 2  ;;  %v565_v50 = vadd.f32 %v564_v48, %v563_v46 }
 0x24b   : > { %v556_v51 = vadd.f32 %v555_v49, %v554_v47  ;;  %v566_v52 = vrot.slane %v565_v50, 2 }
 0x24d   : > { %v557_v53 = vrot.slane %v556_v51, 1  ;;  %v567_v54 = vadd.f32 %v566_v52, %v565_v50 }
 0x24f   : > { %v558_v55 = vadd.f32 %v557_v53, %v556_v51  ;;  %v568_v56 = vrot.slane %v567_v54, 1 }
 0x251   : > { %v560_v57 = vmul.f32 0.0625, %v558_v55  ;;  %v569_v58 = vadd.f32 %v568_v56, %v567_v54 }
 0x253   : > { %v570_v59 = vmul.f32 0.0625, %v569_v58  ;;  %v571_v60 = vmul.f32 %v560_v57, %v560_v57  ;;  %v575_v61 = vsub.f32 %v551_v42, %v560_v57  ;;  %v574_v62 = vsub.f32 %v550_v39, %v560_v57 }
 0x255   : > { %v572_v63 = vsub.f32 %v570_v59, %v571_v60 }
 0x257   : > { %v573_v0 = vmax.f32 %v572_v63, 0.0 }
 0x259   : > { %v576_v1 = vadd.f32 1e-05, %v573_v0 }
 0x25b   : > { %965 = vrsqrt.f32 %v576_v1 }
 0x265   : > { %v966_v3 = vpop.eup %965 }
 0x266   : > { %v579_v4 = vmul.f32 %v966_v3, %v575_v61  ;;  %v578_v5 = vmul.f32 %v966_v3, %v574_v62 }
 0x268   : > { %v581_v6 = vpack.c.bf16 %v579_v4, %v578_v5 }
 0x26a   : > { %856 = vmatpush3.bf16.msra.mxu1 %v581_v6 }
 0x26d   : > { %858 = vmatmul.mubr.msk.bf16.vlgmr.msra.gmra.mrb[4].mxu1 %vm588_vm4, %v580_v7 }
 0x340   : > { %v626_v9 = vpop.f32.mrb[4].mxu1 }
 0x341   : > { %v627_v10 = vadd.f32 %v626_v9, %v586_v8  ;;  %v859_v11 = vpop.f32.mrb[5].mxu1 }
 0x342   : > { %v629_v12 = vpop.f32.mrb[6].mxu1 }
 0x343   : > { %v632_v13 = vmax.f32 %v627_v10, 0.0  ;;  %v860_v14 = vpop.f32.mrb[7].mxu1 }
 0x345   : > { %v633_v15 = vrot.slane %v632_v13, 4  ;;  %v641_v16 = vmul.f32 %v632_v13, %v632_v13 }
 0x347   : > { %v634_v17 = vadd.f32 %v633_v15, %v632_v13  ;;  %v642_v18 = vrot.slane %v641_v16, 4 }
 0x349   : > { %v643_v19 = vadd.f32 %v642_v18, %v641_v16  ;;  %v635_v20 = vrot.slane %v634_v17, 2 }
 0x34b   : > { %v644_v21 = vrot.slane %v643_v19, 2  ;;  %v636_v22 = vadd.f32 %v635_v20, %v634_v17 }
 0x34d   : > { %v645_v23 = vadd.f32 %v644_v21, %v643_v19  ;;  %v637_v24 = vrot.slane %v636_v22, 1 }
 0x34f   : > { %v638_v25 = vadd.f32 %v637_v24, %v636_v22  ;;  %v646_v26 = vrot.slane %v645_v23, 1 }
 0x351   : > { %v640_v27 = vmul.f32 0.125, %v638_v25  ;;  %v647_v28 = vadd.f32 %v646_v26, %v645_v23 }
 0x353   : > { %v648_v29 = vmul.f32 0.125, %v647_v28  ;;  %v649_v30 = vmul.f32 %v640_v27, %v640_v27  ;;  %v652_v35 = vsub.f32 %v632_v13, %v640_v27 }
 0x355   : > { %v650_v31 = vsub.f32 %v648_v29, %v649_v30 }
 0x357   : > { %v651_v32 = vmax.f32 %v650_v31, 0.0 }
 0x359   : > { %v653_v33 = vadd.f32 1e-05, %v651_v32 }
 0x35b   : > { %967 = vrsqrt.f32 %v653_v33 }
 0x365   : > { %v968_v34 = vpop.eup %967 }
 0x366   : > { %v655_v37 = vmul.f32 %v968_v34, %v652_v35 }
 0x368   : > { %v662_v38 = vmul.f32 %v660_v36, %v655_v37 }
 0x36a   : > { %v663_v39 = vrot.slane %v662_v38, 4 }
 0x36c   : > { %v664_v40 = vadd.f32 %v663_v39, %v662_v38 }
 0x36e   : > { %v665_v41 = vrot.slane %v664_v40, 2 }
 0x370   : > { %v666_v42 = vadd.f32 %v665_v41, %v664_v40 }
 0x372   : > { %v667_v43 = vrot.slane %v666_v42, 1 }
 0x374   : > { %v668_v44 = vadd.f32 %v667_v43, %v666_v42 }
 0x376   : > { %v675_v45 = vadd.f32 %v673_v2, %v668_v44 }
 0x378   : > { %v780_v46 = vmul.f32 -1.442695, %v675_v45 }
 0x37a   : > { %969 = vpow2.f32 %v780_v46 }
 0x384   : > { %v970_v47 = vpop.eup %969 }
 0x385   : > { %v679_v48 = vadd.f32 1.0, %v970_v47 }
 0x387   : > { %971 = vrcp.f32 %v679_v48 }
 0x391   : > { %v972_v49 = vpop.eup %971 }
 0x392   : > { %682 = vst [vmem:[%s244_s10] sm:$0x1] %v972_v49 }
 0x393   : > { %986 = shalt.err (!%p983_p3)
}
 0x394   : > { %s987_s9 = scalar_lea.hbm %s1247_s14, 16  ;;  %s991_s26 = scalar_lea.hbm %s1295_s6, 32 }
 0x395   : > { %p988_p4 = scmp.ne.s32.totalorder %s1247_s14, %s987_s9  ;;  %p992_p9 = scmp.lt.u32.totalorder %s1247_s14, %s1295_s6 }
 0x396   : > { %p993_p10 = scmp.lt.u32.totalorder %s991_s26, %s987_s9  ;;  %p995_p12 = scmp.lt.u32.totalorder %s987_s9, %s1247_s14 }
 0x397   : > { %p989_p7 = pnand %p988_p4, %p1114_p5 }
 0x398   : > { %p994_p11 = por %p993_p10, %p992_p9 }
 0x399   : > { %p990_p8 = pneg %p989_p7 }
 0x39a   : > { %p996_p13 = por %p995_p12, %p994_p11 }
 0x39c   : > { %p997_p0 = pnand %p996_p13, %p990_p8 }
 0x39e   : > { %1000 = shalt.err (!%p997_p0)
}
 0x39f   : > { %909 = dma.vmem_to_hbm [thread:$0]  (%p1114_p5), %s1249_s11, 16, %s1247_s14, %s684_s15  }
 0x3a0 PF: > { %p915_p1 = scmp.ge.s32.totalorder %s1035_s24, 2  ;;  %s708_s10 = sand.u32 1, %s1023_s21  }
 0x3a1   : > { %s709_s12 = scalar_lea.sflag [#allocation3], %s708_s10 }
 0x3a2   : > { %p912_p2 = pnand %p915_p1, %p1118_p6 }
 0x3a4   : > { %1018 = dma.done.wait (!%p912_p2), %s709_s12, 16  }
 0x3a5   : > { %1020 = vsyncadd (!%p912_p2), %s709_s12, 4294967280  ;;  %p16_p3 = scmp.ge.s32.totalorder %s1102_s27, 4   ;;  %s1300_s21 = smov %s1027_s22 }
 0x3a6   : > { %s1301_s22 = smov %s1031_s23  ;;  %s1302_s23 = smov %s1112_s30 }
 0x3a7   : > { %s1303_s24 = smov %s1102_s27  ;;  %18 = sbr.rel (!%p16_p3) target bundleno = 3 (0x3), region = 79 }
 0x3ae   :  { %713 = vsyncpa [#allocation3], 1 }
 0x3af   :  { %715 = vsyncpa [#allocation3 + $0x1], 1 }

</bundles_post_ra>
